<compile_context>
chip_gen: v5e
topology: v5e:2x2
jax: 0.10.0
libtpu: 0.0.40
codegen_flags: <defaults>
</compile_context>

<pallas_src>
import jax
import jax.numpy as jnp
import numpy as np
from jax.experimental import pallas as pl
from jax.experimental.pallas import tpu as pltpu


def _round_up(x, m):
    return ((x + m - 1) // m) * m


def _critic_kernel(data_ref, w_emb_ref, w_p1_ref, w_mid_ref, w_post_ref,
                   w_out_ref, b_ref, out_ref):
    f32 = jnp.float32
    bf16 = jnp.bfloat16

    x = data_ref[...].astype(bf16)                       # (TB, obs_dim + z_dim)

    # Fused embedding: data @ [w_obs; w_z] + (b_obs + b_z)   -> (TB, 128)
    h = jnp.dot(x, w_emb_ref[...], preferred_element_type=f32) + b_ref[0:1, :128]

    # latent_policy layer 1: Linear(128, 256) + ReLU
    h = jnp.dot(h.astype(bf16), w_p1_ref[...], preferred_element_type=f32) + b_ref[1:2, :]
    h = jnp.maximum(h, 0.0)

    # latent_policy layer 2 + latent_policy2 layers 1 & 2: three 256->256 + ReLU
    for k in range(3):                                   # static unroll
        h = jnp.dot(h.astype(bf16), w_mid_ref[k],
                    preferred_element_type=f32) + b_ref[2 + k:3 + k, :]
        h = jnp.maximum(h, 0.0)

    # post_pol: Linear(256, 32) + ReLU
    h = jnp.dot(h.astype(bf16), w_post_ref[...],
                preferred_element_type=f32) + b_ref[5:6, :32]
    h = jnp.maximum(h, 0.0)                              # (TB, 32)

    # out: Linear(32, 1) done as a VPU reduce (no MXU round-trip for 1 lane)
    q = jnp.sum(h * w_out_ref[...], axis=-1, keepdims=True) + b_ref[6:7, 0:1]

    out_ref[...] = q.astype(out_ref.dtype)


def critic_forward(data, packed, *, block_b=512):
    """data: (B, obs_dim + z_dim) f32.  packed: output of make_critic_params."""
    w_emb, w_p1, w_mid, w_post, w_out_row, biases = packed
    B, F = data.shape
    tb = min(block_b, _round_up(B, 8))
    grid = (pl.cdiv(B, tb),)

    def resident(shape):
        nd = len(shape)
        # Constant block index -> the block is not re-fetched across grid steps.
        return pl.BlockSpec(shape, lambda i, _nd=nd: (0,) * _nd)

    return pl.pallas_call(
        _critic_kernel,
        out_shape=jax.ShapeDtypeStruct((B, 1), jnp.float32),
        grid=grid,
        in_specs=[
            pl.BlockSpec((tb, F), lambda i: (i, 0)),     # data, tiled over batch
            resident(w_emb.shape),
            resident(w_p1.shape),
            resident(w_mid.shape),
            resident(w_post.shape),
            resident(w_out_row.shape),
            resident(biases.shape),
        ],
        out_specs=pl.BlockSpec((tb, 1), lambda i: (i, 0)),
        compiler_params=pltpu.CompilerParams(
            dimension_semantics=("parallel",)),
    )(data, w_emb, w_p1, w_mid, w_post, w_out_row, biases)


def _linear_params(key, in_dim, out_dim):
    """PyTorch nn.Linear default init U(-k, k), k = 1/sqrt(in_dim).
    Returns W as (in, out) (already transposed) and b as (out,)."""
    k = 1.0 / np.sqrt(in_dim)
    kw, kb = jax.random.split(key)
    w = jax.random.uniform(kw, (in_dim, out_dim), jnp.float32, -k, k)
    b = jax.random.uniform(kb, (out_dim,), jnp.float32, -k, k)
    return w, b


def make_critic_params(key, obs_dim, z_dim, net_arch=(256, 256)):
    """Build packed kernel params:
       w_emb (obs+z,128) bf16, w_p1 (128,256) bf16, w_mid (3,256,256) bf16,
       w_post (256,32) bf16, w_out_row (1,32) f32, biases (8,256) f32."""
    keys = jax.random.split(key, 8)
    w_obs, b_obs = _linear_params(keys[0], obs_dim, 128)
    w_z, b_z = _linear_params(keys[1], z_dim, 128)
    w_p1, b_p1 = _linear_params(keys[2], 128, net_arch[0])
    w_p2, b_p2 = _linear_params(keys[3], net_arch[0], net_arch[1])
    w_q1, b_q1 = _linear_params(keys[4], 256, net_arch[0])
    w_q2, b_q2 = _linear_params(keys[5], net_arch[0], net_arch[1])
    w_post, b_post = _linear_params(keys[6], net_arch[-1], 32)
    w_out, b_out = _linear_params(keys[7], 32, 1)

    bf16 = jnp.bfloat16
    w_emb = jnp.concatenate([w_obs, w_z], axis=0).astype(bf16)    # (obs+z, 128)
    w_mid = jnp.stack([w_p2, w_q1, w_q2], axis=0).astype(bf16)    # (3, 256, 256)
    w_out_row = w_out.T.astype(jnp.float32)                       # (1, 32)

    H = max(net_arch)                                             # 256
    biases = jnp.zeros((8, H), jnp.float32)
    biases = biases.at[0, :128].set(b_obs + b_z)
    biases = biases.at[1, :net_arch[0]].set(b_p1)
    biases = biases.at[2, :net_arch[1]].set(b_p2)
    biases = biases.at[3, :net_arch[0]].set(b_q1)
    biases = biases.at[4, :net_arch[1]].set(b_q2)
    biases = biases.at[5, :32].set(b_post)
    biases = biases.at[6, 0].set(b_out[0])

    return (w_emb, w_p1.astype(bf16), w_mid, w_post.astype(bf16),
            w_out_row, biases)


def _reference_forward(data, packed):
    """Pure-JAX reference mirroring the kernel math (bf16 weights/activations
    into the dots, f32 accumulation). The bf16 weight quantization deviates
    ~1e-2 from the f32 PyTorch module; forward structure is identical."""
    w_emb, w_p1, w_mid, w_post, w_out_row, biases = packed
    f32, bf16 = jnp.float32, jnp.bfloat16
    h = jnp.dot(data.astype(bf16), w_emb, preferred_element_type=f32) + biases[0:1, :128]
    h = jnp.maximum(jnp.dot(h.astype(bf16), w_p1, preferred_element_type=f32)
                    + biases[1:2, :], 0.0)
    for k in range(3):
        h = jnp.maximum(jnp.dot(h.astype(bf16), w_mid[k], preferred_element_type=f32)
                        + biases[2 + k:3 + k, :], 0.0)
    h = jnp.maximum(jnp.dot(h.astype(bf16), w_post, preferred_element_type=f32)
                    + biases[5:6, :32], 0.0)
    return jnp.sum(h * w_out_row, axis=-1, keepdims=True) + biases[6, 0]


if __name__ == "__main__":
    obs_dim, z_dim, B = 16, 8, 8
    key = jax.random.PRNGKey(0)
    k_data, k_params = jax.random.split(key)

    data = jax.random.normal(k_data, (B, obs_dim + z_dim), jnp.float32)
    packed = make_critic_params(k_params, obs_dim, z_dim)

    q = critic_forward(data, packed)
    q = jax.block_until_ready(q)

    q_ref = _reference_forward(data, packed)
    assert q.shape == (B, 1)
    np.testing.assert_allclose(np.asarray(q), np.asarray(q_ref),
                               rtol=1e-3, atol=1e-3)

    print("KERNEL_OK")
</pallas_src>

<mosaic_0001>
module attributes {stable_mosaic.version = 11 : i64} {
  func.func @_critic_kernel(%arg0: i32, %arg1: memref<8x24xf32, #tpu.memory_space<vmem>>, %arg2: memref<24x128xbf16, #tpu.memory_space<vmem>>, %arg3: memref<128x256xbf16, #tpu.memory_space<vmem>>, %arg4: memref<3x256x256xbf16, #tpu.memory_space<vmem>>, %arg5: memref<256x32xbf16, #tpu.memory_space<vmem>>, %arg6: memref<1x32xf32, #tpu.memory_space<vmem>>, %arg7: memref<8x256xf32, #tpu.memory_space<vmem>>, %arg8: memref<8x1xf32, #tpu.memory_space<vmem>>) attributes {dimension_semantics = [#tpu.dimension_semantics<parallel>], iteration_bounds = array<i64: 1>, scalar_prefetch = 0 : i64, scratch_operands = 0 : i64, tpu.core_type = #tpu.core_type<tc>, window_params = [{transform_indices = @transform_0, window_bounds = array<i64: 8, 24>}, {pipeline_mode = #tpu.pipeline_mode<synchronous>, transform_indices = @transform_1, window_bounds = array<i64: 24, 128>}, {pipeline_mode = #tpu.pipeline_mode<synchronous>, transform_indices = @transform_2, window_bounds = array<i64: 128, 256>}, {pipeline_mode = #tpu.pipeline_mode<synchronous>, transform_indices = @transform_3, window_bounds = array<i64: 3, 256, 256>}, {pipeline_mode = #tpu.pipeline_mode<synchronous>, transform_indices = @transform_4, window_bounds = array<i64: 256, 32>}, {pipeline_mode = #tpu.pipeline_mode<synchronous>, transform_indices = @transform_5, window_bounds = array<i64: 1, 32>}, {pipeline_mode = #tpu.pipeline_mode<synchronous>, transform_indices = @transform_6, window_bounds = array<i64: 8, 256>}, {transform_indices = @transform_7, window_bounds = array<i64: 8, 1>}]} {
    %c0 = arith.constant 0 : index
    %c0_0 = arith.constant 0 : index
    %0 = vector.load %arg1[%c0, %c0_0] : memref<8x24xf32, #tpu.memory_space<vmem>>, vector<8x24xf32>
    %1 = arith.truncf %0 : vector<8x24xf32> to vector<8x24xbf16>
    %c0_1 = arith.constant 0 : index
    %c0_2 = arith.constant 0 : index
    %2 = vector.load %arg2[%c0_1, %c0_2] : memref<24x128xbf16, #tpu.memory_space<vmem>>, vector<24x128xbf16>
    %cst = arith.constant dense<0.000000e+00> : vector<8x128xf32>
    %3 = tpu.matmul %1, %2, %cst {dimension_numbers = #tpu.dot_dimension_numbers<[1], [0], [0], [1], [0, 0, 1, 1], [], []>} : vector<8x24xbf16>, vector<24x128xbf16>, vector<8x128xf32> -> vector<8x128xf32>
    %c0_3 = arith.constant 0 : index
    %c0_4 = arith.constant 0 : index
    %4 = vector.load %arg7[%c0_3, %c0_4] : memref<8x256xf32, #tpu.memory_space<vmem>>, vector<1x128xf32>
    %5 = vector.broadcast %4 : vector<1x128xf32> to vector<8x128xf32>
    %6 = arith.addf %3, %5 : vector<8x128xf32>
    %7 = arith.truncf %6 : vector<8x128xf32> to vector<8x128xbf16>
    %c0_5 = arith.constant 0 : index
    %c0_6 = arith.constant 0 : index
    %8 = vector.load %arg3[%c0_5, %c0_6] : memref<128x256xbf16, #tpu.memory_space<vmem>>, vector<128x256xbf16>
    %cst_7 = arith.constant dense<0.000000e+00> : vector<8x256xf32>
    %9 = tpu.matmul %7, %8, %cst_7 {dimension_numbers = #tpu.dot_dimension_numbers<[1], [0], [0], [1], [0, 0, 1, 1], [], []>} : vector<8x128xbf16>, vector<128x256xbf16>, vector<8x256xf32> -> vector<8x256xf32>
    %c1 = arith.constant 1 : index
    %c0_8 = arith.constant 0 : index
    %10 = vector.load %arg7[%c1, %c0_8] : memref<8x256xf32, #tpu.memory_space<vmem>>, vector<1x256xf32>
    %11 = vector.broadcast %10 : vector<1x256xf32> to vector<8x256xf32>
    %12 = arith.addf %9, %11 : vector<8x256xf32>
    %cst_9 = arith.constant 0.000000e+00 : f32
    %13 = vector.broadcast %cst_9 : f32 to vector<8x256xf32>
    %14 = arith.maximumf %12, %13 : vector<8x256xf32>
    %15 = arith.truncf %14 : vector<8x256xf32> to vector<8x256xbf16>
    %c0_10 = arith.constant 0 : index
    %c0_11 = arith.constant 0 : index
    %c0_12 = arith.constant 0 : index
    %16 = vector.load %arg4[%c0_10, %c0_11, %c0_12] : memref<3x256x256xbf16, #tpu.memory_space<vmem>>, vector<1x256x256xbf16>
    %17 = vector.shape_cast %16 : vector<1x256x256xbf16> to vector<256x256xbf16>
    %cst_13 = arith.constant dense<0.000000e+00> : vector<8x256xf32>
    %18 = tpu.matmul %15, %17, %cst_13 {dimension_numbers = #tpu.dot_dimension_numbers<[1], [0], [0], [1], [0, 0, 1, 1], [], []>} : vector<8x256xbf16>, vector<256x256xbf16>, vector<8x256xf32> -> vector<8x256xf32>
    %c2 = arith.constant 2 : index
    %c0_14 = arith.constant 0 : index
    %19 = vector.load %arg7[%c2, %c0_14] : memref<8x256xf32, #tpu.memory_space<vmem>>, vector<1x256xf32>
    %20 = vector.broadcast %19 : vector<1x256xf32> to vector<8x256xf32>
    %21 = arith.addf %18, %20 : vector<8x256xf32>
    %cst_15 = arith.constant 0.000000e+00 : f32
    %22 = vector.broadcast %cst_15 : f32 to vector<8x256xf32>
    %23 = arith.maximumf %21, %22 : vector<8x256xf32>
    %24 = arith.truncf %23 : vector<8x256xf32> to vector<8x256xbf16>
    %c1_16 = arith.constant 1 : index
    %c0_17 = arith.constant 0 : index
    %c0_18 = arith.constant 0 : index
    %25 = vector.load %arg4[%c1_16, %c0_17, %c0_18] : memref<3x256x256xbf16, #tpu.memory_space<vmem>>, vector<1x256x256xbf16>
    %26 = vector.shape_cast %25 : vector<1x256x256xbf16> to vector<256x256xbf16>
    %cst_19 = arith.constant dense<0.000000e+00> : vector<8x256xf32>
    %27 = tpu.matmul %24, %26, %cst_19 {dimension_numbers = #tpu.dot_dimension_numbers<[1], [0], [0], [1], [0, 0, 1, 1], [], []>} : vector<8x256xbf16>, vector<256x256xbf16>, vector<8x256xf32> -> vector<8x256xf32>
    %c3 = arith.constant 3 : index
    %c0_20 = arith.constant 0 : index
    %28 = vector.load %arg7[%c3, %c0_20] : memref<8x256xf32, #tpu.memory_space<vmem>>, vector<1x256xf32>
    %29 = vector.broadcast %28 : vector<1x256xf32> to vector<8x256xf32>
    %30 = arith.addf %27, %29 : vector<8x256xf32>
    %cst_21 = arith.constant 0.000000e+00 : f32
    %31 = vector.broadcast %cst_21 : f32 to vector<8x256xf32>
    %32 = arith.maximumf %30, %31 : vector<8x256xf32>
    %33 = arith.truncf %32 : vector<8x256xf32> to vector<8x256xbf16>
    %c2_22 = arith.constant 2 : index
    %c0_23 = arith.constant 0 : index
    %c0_24 = arith.constant 0 : index
    %34 = vector.load %arg4[%c2_22, %c0_23, %c0_24] : memref<3x256x256xbf16, #tpu.memory_space<vmem>>, vector<1x256x256xbf16>
    %35 = vector.shape_cast %34 : vector<1x256x256xbf16> to vector<256x256xbf16>
    %cst_25 = arith.constant dense<0.000000e+00> : vector<8x256xf32>
    %36 = tpu.matmul %33, %35, %cst_25 {dimension_numbers = #tpu.dot_dimension_numbers<[1], [0], [0], [1], [0, 0, 1, 1], [], []>} : vector<8x256xbf16>, vector<256x256xbf16>, vector<8x256xf32> -> vector<8x256xf32>
    %c4 = arith.constant 4 : index
    %c0_26 = arith.constant 0 : index
    %37 = vector.load %arg7[%c4, %c0_26] : memref<8x256xf32, #tpu.memory_space<vmem>>, vector<1x256xf32>
    %38 = vector.broadcast %37 : vector<1x256xf32> to vector<8x256xf32>
    %39 = arith.addf %36, %38 : vector<8x256xf32>
    %cst_27 = arith.constant 0.000000e+00 : f32
    %40 = vector.broadcast %cst_27 : f32 to vector<8x256xf32>
    %41 = arith.maximumf %39, %40 : vector<8x256xf32>
    %42 = arith.truncf %41 : vector<8x256xf32> to vector<8x256xbf16>
    %c0_28 = arith.constant 0 : index
    %c0_29 = arith.constant 0 : index
    %43 = vector.load %arg5[%c0_28, %c0_29] : memref<256x32xbf16, #tpu.memory_space<vmem>>, vector<256x32xbf16>
    %cst_30 = arith.constant dense<0.000000e+00> : vector<8x32xf32>
    %44 = tpu.matmul %42, %43, %cst_30 {dimension_numbers = #tpu.dot_dimension_numbers<[1], [0], [0], [1], [0, 0, 1, 1], [], []>} : vector<8x256xbf16>, vector<256x32xbf16>, vector<8x32xf32> -> vector<8x32xf32>
    %c5 = arith.constant 5 : index
    %c0_31 = arith.constant 0 : index
    %45 = vector.load %arg7[%c5, %c0_31] : memref<8x256xf32, #tpu.memory_space<vmem>>, vector<1x32xf32>
    %46 = vector.broadcast %45 : vector<1x32xf32> to vector<8x32xf32>
    %47 = arith.addf %44, %46 : vector<8x32xf32>
    %cst_32 = arith.constant 0.000000e+00 : f32
    %48 = vector.broadcast %cst_32 : f32 to vector<8x32xf32>
    %49 = arith.maximumf %47, %48 : vector<8x32xf32>
    %c0_33 = arith.constant 0 : index
    %c0_34 = arith.constant 0 : index
    %50 = vector.load %arg6[%c0_33, %c0_34] : memref<1x32xf32, #tpu.memory_space<vmem>>, vector<1x32xf32>
    %51 = vector.broadcast %50 : vector<1x32xf32> to vector<8x32xf32>
    %52 = arith.mulf %49, %51 : vector<8x32xf32>
    %cst_35 = arith.constant dense<0.000000e+00> : vector<8xf32>
    %53 = vector.multi_reduction <add>, %52, %cst_35 [1] : vector<8x32xf32> to vector<8xf32>
    %54 = vector.shape_cast %53 : vector<8xf32> to vector<8x1xf32>
    %c6 = arith.constant 6 : index
    %c0_36 = arith.constant 0 : index
    %55 = vector.load %arg7[%c6, %c0_36] : memref<8x256xf32, #tpu.memory_space<vmem>>, vector<1x1xf32>
    %56 = vector.broadcast %55 : vector<1x1xf32> to vector<8x1xf32>
    %57 = arith.addf %54, %56 : vector<8x1xf32>
    %c0_37 = arith.constant 0 : index
    %c0_38 = arith.constant 0 : index
    %58 = vector.load %arg8[%c0_37, %c0_38] : memref<8x1xf32, #tpu.memory_space<vmem>>, vector<8x1xf32>
    tpu.vector_store %arg8[%c0_37, %c0_38], %57 {strides = array<i32>} : memref<8x1xf32, #tpu.memory_space<vmem>>, vector<8x1xf32>,
    return
  }
  func.func @transform_0(%arg0: i32) -> (i32, i32) {
    %c0_i32 = arith.constant 0 : i32
    %c0_i32_0 = arith.constant 0 : i32
    return %arg0, %c0_i32 : i32, i32
  }
  func.func @transform_1(%arg0: i32) -> (i32, i32) {
    %c0_i32 = arith.constant 0 : i32
    %c0_i32_0 = arith.constant 0 : i32
    %c0_i32_1 = arith.constant 0 : i32
    return %c0_i32, %c0_i32_0 : i32, i32
  }
  func.func @transform_2(%arg0: i32) -> (i32, i32) {
    %c0_i32 = arith.constant 0 : i32
    %c0_i32_0 = arith.constant 0 : i32
    %c0_i32_1 = arith.constant 0 : i32
    return %c0_i32, %c0_i32_0 : i32, i32
  }
  func.func @transform_3(%arg0: i32) -> (i32, i32, i32) {
    %c0_i32 = arith.constant 0 : i32
    %c0_i32_0 = arith.constant 0 : i32
    %c0_i32_1 = arith.constant 0 : i32
    %c0_i32_2 = arith.constant 0 : i32
    return %c0_i32, %c0_i32_0, %c0_i32_1 : i32, i32, i32
  }
  func.func @transform_4(%arg0: i32) -> (i32, i32) {
    %c0_i32 = arith.constant 0 : i32
    %c0_i32_0 = arith.constant 0 : i32
    %c0_i32_1 = arith.constant 0 : i32
    return %c0_i32, %c0_i32_0 : i32, i32
  }
  func.func @transform_5(%arg0: i32) -> (i32, i32) {
    %c0_i32 = arith.constant 0 : i32
    %c0_i32_0 = arith.constant 0 : i32
    %c0_i32_1 = arith.constant 0 : i32
    return %c0_i32, %c0_i32_0 : i32, i32
  }
  func.func @transform_6(%arg0: i32) -> (i32, i32) {
    %c0_i32 = arith.constant 0 : i32
    %c0_i32_0 = arith.constant 0 : i32
    %c0_i32_1 = arith.constant 0 : i32
    return %c0_i32, %c0_i32_0 : i32, i32
  }
  func.func @transform_7(%arg0: i32) -> (i32, i32) {
    %c0_i32 = arith.constant 0 : i32
    %c0_i32_0 = arith.constant 0 : i32
    return %arg0, %c0_i32 : i32, i32
  }
}

</mosaic_0001>

<bundles_post_ra>
// kernel: tpu_custom_call.1
= control target key start
LH: loop header
LB: loop body
LE: loop exit
PB: predicated region body
PF: predicated region fallthrough
CT: control target
= control target key end

     0   :  { %12 = vsyncpa [#allocation3], 0  ;;  %s2103_s0 = inlined_call_operand.hbm [shape: f32[8,24], index: 0, kind: input, shape index: {}]   ;;  %s2104_s1 = inlined_call_operand.vmem [shape: bf16[24,128], index: 1, kind: input, shape index: {}]   ;;  %s2105_s2 = inlined_call_operand.vmem [shape: bf16[128,256], index: 2, kind: input, shape index: {}]   ;;  %s2106_s3 = inlined_call_operand.hbm [shape: bf16[3,256,256], index: 3, kind: input, shape index: {}]   ;;  %s2107_s4 = inlined_call_operand.vmem [shape: bf16[256,32], index: 4, kind: input, shape index: {}]   ;;  %s2108_s5 = inlined_call_operand.vmem [shape: f32[1,32], index: 5, kind: input, shape index: {}]   ;;  %s2109_s6 = inlined_call_operand.vmem [shape: f32[8,256], index: 6, kind: input, shape index: {}]   ;;  %s2110_s7 = inlined_call_operand.vmem [shape: f32[8,1], index: 7, kind: output, shape index: {}]  }
   0x1   :  { %s19_s26 = sshll.u32 %s2103_s0, 4  ;;  %s20_s26 = int_to_ptr.hbm [resolvable:$true] %s19_s26 }
   0x2   :  { %13 = vsyncpa [#allocation5], 0  ;;  %s1876_s27 = smov [#allocation2]   ;;  %s33_s8 = sshll.u32 %s2106_s3, 4  ;;  %s34_s8 = int_to_ptr.hbm [resolvable:$true] %s33_s8 }
   0x3   :  { %s21_s28 = sshll.u32 %s1876_s27, 4  ;;  %s1877_s9 = smov [#allocation4]   ;;  %s22_s28 = int_to_ptr.vmem [resolvable:$true] %s21_s28 }
   0x4   :  { %24 = dma.hbm_to_vmem [thread:$0]  %s20_s26, 128, %s22_s28, [#allocation3]  }
   0x5   :  { %s35_s10 = sshll.u32 %s1877_s9, 4  ;;  %s1878_s11 = smov 128   ;;  %s36_s10 = int_to_ptr.vmem [resolvable:$true] %s35_s10 }
   0x6   :  { %s1879_s12 = smov 8  }
   0x7   :  { %41 = dma.hbm_to_vmem [thread:$0]  %s34_s8, 12288, %s36_s10, [#allocation5], %s1878_s11, %s1878_s11, %s1879_s12  }
   0x8   :  { %1872 = dma.done.wait [#allocation3], 128  }
   0x9   :  { %1873 = vsyncadd [#allocation3], 4294967168 }
   0xa   :  { %1874 = dma.done.wait [#allocation5], 12288  }
   0xb   :  { %1875 = vsyncadd [#allocation5], 4294955008  ;;  %v61_v0 = vld [vmem:[%s2104_s1 + $0x8] sm:$0xf]  ;;  %vm76_vm0 = vcmask 1043456   ;;  %v1690_v15 = vld [vmem:[%s2104_s1] sm:$0xff] }
   0xc   :  { %v68_v1 = vunpack.c.l.b16 %v61_v0  ;;  %v1233_v2 = vld [vmem:[%s2105_s2 + $0x70] sm:$0xf]  ;;  %v1706_v3 = vld [vmem:[%s2105_s2 + $0x74] sm:$0xf0]  ;;  %v1705_v4 = vld [vmem:[%s2105_s2 + $0x74] sm:$0xf] }
   0xd   :  { %v1234_v5 = vor.u32 %v1706_v3, %v1233_v2  ;;  %v1235_v6 = vld [vmem:[%s2105_s2 + $0x78] sm:$0xf0]  ;;  %v1225_v7 = vld [vmem:[%s2105_s2 + $0x60] sm:$0xf]  ;;  %v1704_v8 = vld [vmem:[%s2105_s2 + $0x64] sm:$0xf0] }
   0xe   :  { %v70_v9 = vpack.c.b16 %v68_v1, %v68_v1  ;;  %v1238_v10 = vor.u32 %v1705_v4, %v1235_v6  ;;  %v1703_v11 = vld [vmem:[%s2105_s2 + $0x64] sm:$0xf]  ;;  %v1227_v12 = vld [vmem:[%s2105_s2 + $0x68] sm:$0xf0]  ;;  %v1226_v13 = vor.u32 %v1704_v8, %v1225_v7  ;;  %v1217_v17 = vld [vmem:[%s2105_s2 + $0x50] sm:$0xf] }
   0xf   :  { %197 = vmatpush.bf16.msra.mxu1 %v1234_v5  ;;  %v1230_v16 = vor.u32 %v1703_v11, %v1227_v12  ;;  %v1702_v18 = vld [vmem:[%s2105_s2 + $0x54] sm:$0xf0]  ;;  %v57_v19 = vld [vmem:[#allocation2] sm:$0xff]  ;;  %v1701_v20 = vld [vmem:[%s2105_s2 + $0x54] sm:$0xf]  ;;  %vm72_vm1 = vcmask 195584  }
  0x10   :  { %v78_v14 = vsel %vm76_vm0, %v70_v9, 0  ;;  %210 = vmatpush.bf16.msra.mxu2 %v1238_v10  ;;  %v1219_v21 = vld [vmem:[%s2105_s2 + $0x58] sm:$0xf0]  ;;  %v1218_v22 = vor.u32 %v1702_v18, %v1217_v17  ;;  %v58_v23 = vpack.c.bf16 %v57_v19, %v57_v19  ;;  %v1209_v25 = vld [vmem:[%s2105_s2 + $0x40] sm:$0xf]  ;;  %vm1155_vm2 = vcmask 261120  }
  0x11   :  { %86 = vmatpush.bf16.msra.mxu0 %v78_v14  ;;  %v1222_v24 = vor.u32 %v1701_v20, %v1219_v21  ;;  %v1700_v26 = vld [vmem:[%s2105_s2 + $0x44] sm:$0xf0]  ;;  %v1699_v27 = vld [vmem:[%s2105_s2 + $0x44] sm:$0xf]  ;;  %v1211_v28 = vld [vmem:[%s2105_s2 + $0x48] sm:$0xf0] }
  0x12   :  { %v1210_v29 = vor.u32 %v1700_v26, %v1209_v25  ;;  %v1214_v30 = vor.u32 %v1699_v27, %v1211_v28  ;;  %v1201_v31 = vld [vmem:[%s2105_s2 + $0x30] sm:$0xf]  ;;  %v1698_v32 = vld [vmem:[%s2105_s2 + $0x34] sm:$0xf0]  ;;  %v1697_v33 = vld [vmem:[%s2105_s2 + $0x34] sm:$0xf] }
  0x13   :  { %198 = vmatpush.bf16.msra.mxu1 %v1226_v13  ;;  %v1203_v34 = vld [vmem:[%s2105_s2 + $0x38] sm:$0xf0]  ;;  %v1202_v35 = vor.u32 %v1698_v32, %v1201_v31  ;;  %v1193_v37 = vld [vmem:[%s2105_s2 + $0x20] sm:$0xf]  ;;  %v1696_v38 = vld [vmem:[%s2105_s2 + $0x24] sm:$0xf0] }
  0x14   :  { %211 = vmatpush.bf16.msra.mxu2 %v1230_v16  ;;  %v1206_v36 = vor.u32 %v1697_v33, %v1203_v34  ;;  %v1695_v39 = vld [vmem:[%s2105_s2 + $0x24] sm:$0xf]  ;;  %v1195_v40 = vld [vmem:[%s2105_s2 + $0x28] sm:$0xf0]  ;;  %v1194_v41 = vor.u32 %v1696_v38, %v1193_v37  ;;  %v1185_v43 = vld [vmem:[%s2105_s2 + $0x10] sm:$0xf] }
  0x15   :  { %87 = vmatpush.bf16.msra.mxu0 %v1690_v15  ;;  %v1198_v42 = vor.u32 %v1695_v39, %v1195_v40  ;;  %v1694_v44 = vld [vmem:[%s2105_s2 + $0x14] sm:$0xf0]  ;;  %v1693_v45 = vld [vmem:[%s2105_s2 + $0x14] sm:$0xf]  ;;  %v1187_v46 = vld [vmem:[%s2105_s2 + $0x18] sm:$0xf0] }
  0x16   :  { %v1186_v47 = vor.u32 %v1694_v44, %v1185_v43  ;;  %v1190_v48 = vor.u32 %v1693_v45, %v1187_v46  ;;  %v1177_v49 = vld [vmem:[%s2105_s2] sm:$0xf]  ;;  %v1692_v50 = vld [vmem:[%s2105_s2 + $0x4] sm:$0xf0]  ;;  %v1691_v51 = vld [vmem:[%s2105_s2 + $0x4] sm:$0xf] }
  0x17   :  { %199 = vmatpush.bf16.msra.mxu1 %v1218_v22  ;;  %v1178_v52 = vor.u32 %v1692_v50, %v1177_v49  ;;  %v1179_v53 = vld [vmem:[%s2105_s2 + $0x8] sm:$0xf0]  ;;  %v1298_v55 = vld [vmem:[#allocation4 + $0x70] sm:$0xf]  ;;  %v1722_v56 = vld [vmem:[#allocation4 + $0x74] sm:$0xf0] }
  0x18   :  { %1173 = vmatmul.msk.bf16.vlgmr.msra.gmra.mxu0 %vm72_vm1, %v58_v23  ;;  %212 = vmatpush.bf16.msra.mxu2 %v1222_v24  ;;  %v1182_v54 = vor.u32 %v1691_v51, %v1179_v53  ;;  %v1721_v57 = vld [vmem:[#allocation4 + $0x74] sm:$0xf]  ;;  %v1299_v58 = vor.u32 %v1722_v56, %v1298_v55  ;;  %v1300_v59 = vld [vmem:[#allocation4 + $0x78] sm:$0xf0]  ;;  %v1290_v60 = vld [vmem:[#allocation4 + $0x60] sm:$0xf] }
  0x19   :  { %v1720_v61 = vld [vmem:[#allocation4 + $0x64] sm:$0xf0]  ;;  %v1303_v62 = vor.u32 %v1721_v57, %v1300_v59  ;;  %v1719_v63 = vld [vmem:[#allocation4 + $0x64] sm:$0xf]  ;;  %v1292_v0 = vld [vmem:[#allocation4 + $0x68] sm:$0xf0] }
  0x1a   :  { %v1362_v1 = vld [vmem:[#allocation4 + $0xf0] sm:$0xf]  ;;  %426 = vmatpush.bf16.msra.mxu3 %v1299_v58  ;;  %v1291_v2 = vor.u32 %v1720_v61, %v1290_v60  ;;  %v1738_v3 = vld [vmem:[#allocation4 + $0xf4] sm:$0xf0]  ;;  %v1737_v4 = vld [vmem:[#allocation4 + $0xf4] sm:$0xf]  ;;  %v1295_v6 = vor.u32 %v1719_v63, %v1292_v0 }
  0x1b   :  { %200 = vmatpush.bf16.msra.mxu1 %v1210_v29  ;;  %v1364_v5 = vld [vmem:[#allocation4 + $0xf8] sm:$0xf0]  ;;  %v1363_v7 = vor.u32 %v1738_v3, %v1362_v1  ;;  %v1282_v9 = vld [vmem:[#allocation4 + $0x50] sm:$0xf]  ;;  %v1718_v10 = vld [vmem:[#allocation4 + $0x54] sm:$0xf0] }
  0x1c   :  { %213 = vmatpush.bf16.msra.mxu2 %v1214_v30  ;;  %v1367_v8 = vor.u32 %v1737_v4, %v1364_v5  ;;  %v1717_v11 = vld [vmem:[#allocation4 + $0x54] sm:$0xf]  ;;  %v1284_v12 = vld [vmem:[#allocation4 + $0x58] sm:$0xf0]  ;;  %v1354_v13 = vld [vmem:[#allocation4 + $0xe0] sm:$0xf]  ;;  %v1283_v18 = vor.u32 %v1718_v10, %v1282_v9 }
  0x1d   :  { %v1736_v14 = vld [vmem:[#allocation4 + $0xe4] sm:$0xf0]  ;;  %439 = vmatpush.bf16.msrb.mxu0 %v1363_v7  ;;  %v1735_v16 = vld [vmem:[#allocation4 + $0xe4] sm:$0xf]  ;;  %v1356_v17 = vld [vmem:[#allocation4 + $0xe8] sm:$0xf0]  ;;  %v1287_v22 = vor.u32 %v1717_v11, %v1284_v12 }
  0x1e   :  { %v1355_v15 = vor.u32 %v1736_v14, %v1354_v13  ;;  %427 = vmatpush.bf16.msra.mxu3 %v1291_v2  ;;  %v1359_v19 = vor.u32 %v1735_v16, %v1356_v17  ;;  %v1274_v20 = vld [vmem:[#allocation4 + $0x40] sm:$0xf]  ;;  %v1716_v21 = vld [vmem:[#allocation4 + $0x44] sm:$0xf0]  ;;  %v1346_v23 = vld [vmem:[#allocation4 + $0xd0] sm:$0xf] }
  0x1f   :  { %201 = vmatpush.bf16.msra.mxu1 %v1202_v35  ;;  %v1734_v24 = vld [vmem:[#allocation4 + $0xd4] sm:$0xf0]  ;;  %v1733_v25 = vld [vmem:[#allocation4 + $0xd4] sm:$0xf]  ;;  %v1715_v26 = vld [vmem:[#allocation4 + $0x44] sm:$0xf]  ;;  %v1275_v32 = vor.u32 %v1716_v21, %v1274_v20 }
  0x20   :  { %214 = vmatpush.bf16.msra.mxu2 %v1206_v36  ;;  %v1276_v27 = vld [vmem:[#allocation4 + $0x48] sm:$0xf0]  ;;  %v1348_v28 = vld [vmem:[#allocation4 + $0xd8] sm:$0xf0]  ;;  %v1347_v29 = vor.u32 %v1734_v24, %v1346_v23  ;;  %v1338_v31 = vld [vmem:[#allocation4 + $0xc0] sm:$0xf] }
  0x21   :  { %440 = vmatpush.bf16.msrb.mxu0 %v1355_v15  ;;  %v1351_v30 = vor.u32 %v1733_v25, %v1348_v28  ;;  %v1732_v33 = vld [vmem:[#allocation4 + $0xc4] sm:$0xf0]  ;;  %v1731_v34 = vld [vmem:[#allocation4 + $0xc4] sm:$0xf]  ;;  %v1340_v35 = vld [vmem:[#allocation4 + $0xc8] sm:$0xf0]  ;;  %v1279_v36 = vor.u32 %v1715_v26, %v1276_v27 }
  0x22   :  { %428 = vmatpush.bf16.msra.mxu3 %v1283_v18  ;;  %v1266_v37 = vld [vmem:[#allocation4 + $0x30] sm:$0xf]  ;;  %v1714_v38 = vld [vmem:[#allocation4 + $0x34] sm:$0xf0]  ;;  %v1713_v39 = vld [vmem:[#allocation4 + $0x34] sm:$0xf] }
  0x23   :  { %202 = vmatpush.bf16.msra.mxu1 %v1194_v41  ;;  %v1268_v40 = vld [vmem:[#allocation4 + $0x38] sm:$0xf0]  ;;  %v1339_v41 = vor.u32 %v1732_v33, %v1338_v31  ;;  %v1330_v43 = vld [vmem:[#allocation4 + $0xb0] sm:$0xf]  ;;  %v1267_v44 = vor.u32 %v1714_v38, %v1266_v37  ;;  %v1730_v45 = vld [vmem:[#allocation4 + $0xb4] sm:$0xf0] }
  0x24   :  { %215 = vmatpush.bf16.msra.mxu2 %v1198_v42  ;;  %v1343_v42 = vor.u32 %v1731_v34, %v1340_v35  ;;  %v1729_v46 = vld [vmem:[#allocation4 + $0xb4] sm:$0xf]  ;;  %v1258_v49 = vld [vmem:[#allocation4 + $0x20] sm:$0xf]  ;;  %v1712_v50 = vld [vmem:[#allocation4 + $0x24] sm:$0xf0]  ;;  %v1331_v53 = vor.u32 %v1730_v45, %v1330_v43 }
  0x25   :  { %441 = vmatpush.bf16.msrb.mxu0 %v1347_v29  ;;  %v1711_v51 = vld [vmem:[#allocation4 + $0x24] sm:$0xf]  ;;  %v1259_v55 = vor.u32 %v1712_v50, %v1258_v49  ;;  %v62_v57 = vld [vmem:[%s2109_s6] ss:$0 sm:$0xff]  ;;  %v1709_v0 = vld [vmem:[#allocation4 + $0x14] sm:$0xf] }
  0x26   :  { %429 = vmatpush.bf16.msra.mxu3 %v1275_v32  ;;  %v1710_v63 = vld [vmem:[#allocation4 + $0x14] sm:$0xf0]  ;;  %v1252_v2 = vld [vmem:[#allocation4 + $0x18] sm:$0xf0]  ;;  %v1322_v4 = vld [vmem:[#allocation4 + $0xa0] sm:$0xf] }
  0x27   :  { %203 = vmatpush.bf16.msra.mxu1 %v1186_v47  ;;  %v1332_v47 = vld [vmem:[#allocation4 + $0xb8] sm:$0xf0]  ;;  %v1255_v3 = vor.u32 %v1709_v0, %v1252_v2  ;;  %v1728_v5 = vld [vmem:[#allocation4 + $0xa4] sm:$0xf0]  ;;  %v1242_v10 = vld [vmem:[#allocation4] sm:$0xf] }
  0x28   :  { %216 = vmatpush.bf16.msra.mxu2 %v1190_v48  ;;  %v1271_v48 = vor.u32 %v1713_v39, %v1268_v40  ;;  %v1323_v7 = vor.u32 %v1728_v5, %v1322_v4  ;;  %v1708_v11 = vld [vmem:[#allocation4 + $0x4] sm:$0xf0]  ;;  %v1707_v12 = vld [vmem:[#allocation4 + $0x4] sm:$0xf]  ;;  %v1244_v14 = vld [vmem:[#allocation4 + $0x8] sm:$0xf0] }
  0x29   :  { %442 = vmatpush.bf16.msrb.mxu0 %v1339_v41  ;;  %v1243_v13 = vor.u32 %v1708_v11, %v1242_v10  ;;  %v1247_v15 = vor.u32 %v1707_v12, %v1244_v14  ;;  %v1314_v16 = vld [vmem:[#allocation4 + $0x90] sm:$0xf]  ;;  %v1726_v17 = vld [vmem:[#allocation4 + $0x94] sm:$0xf0]  ;;  %v1316_v20 = vld [vmem:[#allocation4 + $0x98] sm:$0xf0] }
  0x2a   :  { %430 = vmatpush.bf16.msra.mxu3 %v1267_v44  ;;  %v1315_v18 = vor.u32 %v1726_v17, %v1314_v16  ;;  %v1724_v23 = vld [vmem:[#allocation4 + $0x84] sm:$0xf0]  ;;  %v1723_v24 = vld [vmem:[#allocation4 + $0x84] sm:$0xf]  ;;  %v1308_v26 = vld [vmem:[#allocation4 + $0x88] sm:$0xf0] }
  0x2b   :  { %204 = vmatpush.bf16.msra.mxu1 %v1178_v52  ;;  %v1260_v52 = vld [vmem:[#allocation4 + $0x28] sm:$0xf0]  ;;  %v1311_v27 = vor.u32 %v1723_v24, %v1308_v26  ;;  %v1427_v28 = vld [vmem:[#allocation4 + $0x170] sm:$0xf]  ;;  %v1754_v29 = vld [vmem:[#allocation4 + $0x174] sm:$0xf0] }
  0x2c   :  { %217 = vmatpush.bf16.msra.mxu2 %v1182_v54  ;;  %v1335_v54 = vor.u32 %v1729_v46, %v1332_v47  ;;  %v1263_v56 = vor.u32 %v1711_v51, %v1260_v52  ;;  %v1428_v31 = vor.u32 %v1754_v29, %v1427_v28  ;;  %v1429_v32 = vld [vmem:[#allocation4 + $0x178] sm:$0xf0]  ;;  %v1419_v33 = vld [vmem:[#allocation4 + $0x160] sm:$0xf]  ;;  %v1752_v34 = vld [vmem:[#allocation4 + $0x164] sm:$0xf0] }
  0x2d   :  { %443 = vmatpush.bf16.msrb.mxu0 %v1331_v53  ;;  %v1770_v37 = vld [vmem:[#allocation4 + $0x1f4] sm:$0xf0]  ;;  %v1751_v38 = vld [vmem:[#allocation4 + $0x164] sm:$0xf]  ;;  %v1420_v39 = vor.u32 %v1752_v34, %v1419_v33  ;;  %v1421_v41 = vld [vmem:[#allocation4 + $0x168] sm:$0xf0] }
  0x2e   :  { %431 = vmatpush.bf16.msra.mxu3 %v1259_v55  ;;  %v1493_v43 = vld [vmem:[#allocation4 + $0x1f8] sm:$0xf0]  ;;  %v1424_v44 = vor.u32 %v1751_v38, %v1421_v41  ;;  %v1411_v46 = vld [vmem:[#allocation4 + $0x150] sm:$0xf]  ;;  %v1750_v47 = vld [vmem:[#allocation4 + $0x154] sm:$0xf0] }
  0x2f   :  { %452 = vmatpush.bf16.msrb.mxu1 %v1303_v62  ;;  %v1250_v62 = vld [vmem:[#allocation4 + $0x10] sm:$0xf]  ;;  %v1768_v49 = vld [vmem:[#allocation4 + $0x1e4] sm:$0xf0]  ;;  %v1749_v50 = vld [vmem:[#allocation4 + $0x154] sm:$0xf]  ;;  %v1412_v55 = vor.u32 %v1750_v47, %v1411_v46 }
  0x30   :  { %465 = vmatpush.bf16.msrb.mxu2 %v1367_v8  ;;  %v1251_v1 = vor.u32 %v1710_v63, %v1250_v62  ;;  %v1324_v8 = vld [vmem:[#allocation4 + $0xa8] sm:$0xf0]  ;;  %v1413_v51 = vld [vmem:[#allocation4 + $0x158] sm:$0xf0]  ;;  %v1767_v53 = vld [vmem:[#allocation4 + $0x1e4] sm:$0xf] }
  0x31   :  { %444 = vmatpush.bf16.msrb.mxu0 %v1323_v7  ;;  %v1765_v62 = vld [vmem:[#allocation4 + $0x1d4] sm:$0xf]  ;;  %v1747_v0 = vld [vmem:[#allocation4 + $0x144] sm:$0xf]  ;;  %v1477_v2 = vld [vmem:[#allocation4 + $0x1d8] sm:$0xf0] }
  0x32   :  { %432 = vmatpush.bf16.msra.mxu3 %v1251_v1  ;;  %v1405_v1 = vld [vmem:[#allocation4 + $0x148] sm:$0xf0]  ;;  %v1174_v5 = vld [vmem:[%s2109_s6 + $0x1] ss:$8 sm:$0x3]  ;;  %vm1161_vm3 = vcmask 7168  }
  0x33   :  { %453 = vmatpush.bf16.msrb.mxu1 %v1295_v6  ;;  %v1727_v6 = vld [vmem:[#allocation4 + $0xa4] sm:$0xf]  ;;  %v113_v7 = vperm.slane %v1174_v5, 0  ;;  %v114_v11 = vperm.slane %v1174_v5, 1  ;;  %v1745_v24 = vld [vmem:[#allocation4 + $0x134] sm:$0xf] }
  0x34   :  { %466 = vmatpush.bf16.msrb.mxu2 %v1359_v19  ;;  %v1327_v9 = vor.u32 %v1727_v6, %v1324_v8  ;;  %v1725_v19 = vld [vmem:[#allocation4 + $0x94] sm:$0xf]  ;;  %v1408_v6 = vor.u32 %v1747_v0, %v1405_v1  ;;  %v1763_v28 = vld [vmem:[#allocation4 + $0x1c4] sm:$0xf]  ;;  %v1469_v29 = vld [vmem:[#allocation4 + $0x1c8] sm:$0xf0] }
  0x35   :  { %v1319_v21 = vor.u32 %v1725_v19, %v1316_v20  ;;  %445 = vmatpush.bf16.msrb.mxu0 %v1315_v18  ;;  %v1395_v19 = vld [vmem:[#allocation4 + $0x130] sm:$0xf]  ;;  %v1746_v20 = vld [vmem:[#allocation4 + $0x134] sm:$0xf0]  ;;  %v1461_v41 = vld [vmem:[#allocation4 + $0x1b8] sm:$0xf0] }
  0x36   :  { %433 = vmatpush.bf16.msra.mxu3 %v1243_v13  ;;  %v1459_v33 = vld [vmem:[#allocation4 + $0x1b0] sm:$0xf]  ;;  %v1760_v47 = vld [vmem:[#allocation4 + $0x1a4] sm:$0xf0]  ;;  %v1757_v0 = vld [vmem:[#allocation4 + $0x194] sm:$0xf] }
  0x37   :  { %454 = vmatpush.bf16.msrb.mxu1 %v1287_v22  ;;  %v1306_v22 = vld [vmem:[#allocation4 + $0x80] sm:$0xf]  ;;  %v1445_v1 = vld [vmem:[#allocation4 + $0x198] sm:$0xf0]  ;;  %v1755_v5 = vld [vmem:[#allocation4 + $0x184] sm:$0xf] }
  0x38   :  { %467 = vmatpush.bf16.msrb.mxu2 %v1351_v30  ;;  %v1307_v25 = vor.u32 %v1724_v23, %v1306_v22  ;;  %v1753_v30 = vld [vmem:[#allocation4 + $0x174] sm:$0xf]  ;;  %v1396_v22 = vor.u32 %v1746_v20, %v1395_v19  ;;  %v1764_v23 = vld [vmem:[#allocation4 + $0x1c4] sm:$0xf0]  ;;  %v1622_v19 = vld [vmem:[#allocation4 + $0x2f8] sm:$0xf0] }
  0x39   :  { %v1432_v35 = vor.u32 %v1753_v30, %v1429_v32  ;;  %v1472_v30 = vor.u32 %v1763_v28, %v1469_v29  ;;  %v1744_v32 = vld [vmem:[#allocation4 + $0x124] sm:$0xf0]  ;;  %v1548_v20 = vld [vmem:[#allocation4 + $0x260] sm:$0xf]  ;;  %v1799_v29 = vld [vmem:[#allocation4 + $0x2e4] sm:$0xf] }
  0x3a   :  { %446 = vmatpush.bf16.msrb.mxu0 %v1307_v25  ;;  %682 = vmatpush.bf16.msrb.mxu3 %v1428_v31  ;;  %v1397_v25 = vld [vmem:[#allocation4 + $0x138] sm:$0xf0]  ;;  %v1387_v31 = vld [vmem:[#allocation4 + $0x120] sm:$0xf]  ;;  %v1800_v28 = vld [vmem:[#allocation4 + $0x2e4] sm:$0xf0] }
  0x3b   :  { %455 = vmatpush.bf16.msrb.mxu1 %v1279_v36  ;;  %v1491_v36 = vld [vmem:[#allocation4 + $0x1f0] sm:$0xf]  ;;  %v1388_v34 = vor.u32 %v1744_v32, %v1387_v31  ;;  %v1614_v31 = vld [vmem:[#allocation4 + $0x2e8] sm:$0xf0] }
  0x3c   :  { %468 = vmatpush.bf16.msrb.mxu2 %v1343_v42  ;;  %v1492_v40 = vor.u32 %v1770_v37, %v1491_v36  ;;  %v1769_v42 = vld [vmem:[#allocation4 + $0x1f4] sm:$0xf]  ;;  %v1743_v36 = vld [vmem:[#allocation4 + $0x124] sm:$0xf]  ;;  %v1389_v37 = vld [vmem:[#allocation4 + $0x128] sm:$0xf0] }
  0x3d   :  { %v1496_v45 = vor.u32 %v1769_v42, %v1493_v43  ;;  %v1379_v43 = vld [vmem:[#allocation4 + $0x110] sm:$0xf] }
  0x3e   :  { %695 = vmatpush.bf16.msra.mxu0 %v1492_v40  ;;  %683 = vmatpush.bf16.msrb.mxu3 %v1420_v39  ;;  %v1392_v39 = vor.u32 %v1743_v36, %v1389_v37  ;;  %v1761_v40 = vld [vmem:[#allocation4 + $0x1b4] sm:$0xf]  ;;  %v1540_v32 = vld [vmem:[#allocation4 + $0x250] sm:$0xf]  ;;  %v1542_v36 = vld [vmem:[#allocation4 + $0x258] sm:$0xf0] }
  0x3f   :  { %456 = vmatpush.bf16.msrb.mxu1 %v1271_v48  ;;  %v1483_v48 = vld [vmem:[#allocation4 + $0x1e0] sm:$0xf]  ;;  %v1464_v42 = vor.u32 %v1761_v40, %v1461_v41  ;;  %v1604_v37 = vld [vmem:[#allocation4 + $0x2d0] sm:$0xf]  ;;  %v1797_v40 = vld [vmem:[#allocation4 + $0x2d4] sm:$0xf] }
  0x40   :  { %469 = vmatpush.bf16.msrb.mxu2 %v1335_v54  ;;  %v1484_v52 = vor.u32 %v1768_v49, %v1483_v48  ;;  %v1485_v54 = vld [vmem:[#allocation4 + $0x1e8] sm:$0xf0]  ;;  %v1741_v48 = vld [vmem:[#allocation4 + $0x114] sm:$0xf]  ;;  %v1381_v49 = vld [vmem:[#allocation4 + $0x118] sm:$0xf0] }
  0x41   :  { %v1606_v41 = vld [vmem:[#allocation4 + $0x2d8] sm:$0xf0] }
  0x42   :  { %696 = vmatpush.bf16.msra.mxu0 %v1484_v52  ;;  %684 = vmatpush.bf16.msrb.mxu3 %v1412_v55  ;;  %v1759_v52 = vld [vmem:[#allocation4 + $0x1a4] sm:$0xf]  ;;  %v1371_v55 = vld [vmem:[#allocation4 + $0x100] sm:$0xf] }
  0x43   :  { %457 = vmatpush.bf16.msrb.mxu1 %v1263_v56  ;;  %v1488_v56 = vor.u32 %v1767_v53, %v1485_v54  ;;  %v1453_v53 = vld [vmem:[#allocation4 + $0x1a8] sm:$0xf0] }
  0x44   :  { %470 = vmatpush.bf16.msrb.mxu2 %v1327_v9  ;;  %v1456_v54 = vor.u32 %v1759_v52, %v1453_v53  ;;  %v1598_v52 = vld [vmem:[#allocation4 + $0x2c8] sm:$0xf0] }
  0x47   :  { %458 = vmatpush.bf16.msrb.mxu1 %v1255_v3  ;;  %v1480_v3 = vor.u32 %v1765_v62, %v1477_v2  ;;  %v1448_v2 = vor.u32 %v1757_v0, %v1445_v1 }
  0x48   :  { %471 = vmatpush.bf16.msrb.mxu2 %v1319_v21  ;;  %v1467_v21 = vld [vmem:[#allocation4 + $0x1c0] sm:$0xf] }
  0x49   :  { %v1468_v26 = vor.u32 %v1764_v23, %v1467_v21  ;;  %v1783_v23 = vld [vmem:[#allocation4 + $0x264] sm:$0xf] }
  0x4b   :  { %459 = vmatpush.bf16.msrb.mxu1 %v1247_v15 }
  0x4c   :  { %472 = vmatpush.bf16.msrb.mxu2 %v1311_v27  ;;  %v1400_v27 = vor.u32 %v1745_v24, %v1397_v25  ;;  %v1550_v24 = vld [vmem:[#allocation4 + $0x268] sm:$0xf0] }
  0x95   :  { %v89_v58 = vpop.f32.mrf.mxu0 }
  0x96   :  { %v90_v59 = vadd.f32 %v89_v58, %v62_v57  ;;  %v1475_v57 = vld [vmem:[#allocation4 + $0x1d0] sm:$0xf]  ;;  %v1766_v58 = vld [vmem:[#allocation4 + $0x1d4] sm:$0xf0] }
  0x97   :  { %v1476_v63 = vor.u32 %v1766_v58, %v1475_v57  ;;  %v1443_v57 = vld [vmem:[#allocation4 + $0x190] sm:$0xf] }
  0x98   :  { %v93_v60 = vpack.c.bf16 %v90_v59, %v90_v59  ;;  %v1416_v59 = vor.u32 %v1749_v50, %v1413_v51  ;;  %v1384_v51 = vor.u32 %v1741_v48, %v1381_v49  ;;  %v1534_v48 = vld [vmem:[#allocation4 + $0x248] sm:$0xf0]  ;;  %v1596_v49 = vld [vmem:[#allocation4 + $0x2c0] sm:$0xf] }
  0x99   :  { %697 = vmatpush.bf16.msra.mxu0 %v1476_v63 }
  0x9a   :  { %205 = vmatmul.bf16.vlgmr.msra.gmra.mxu1 %v93_v60  ;;  %218 = vmatmul.bf16.vlgmr.msra.gmra.mxu2 %v93_v60  ;;  %v1403_v60 = vld [vmem:[#allocation4 + $0x140] sm:$0xf] }
  0x9b   :  { %708 = vmatpush.bf16.msra.mxu1 %v1432_v35  ;;  %721 = vmatpush.bf16.msra.mxu2 %v1496_v45  ;;  %v1762_v35 = vld [vmem:[#allocation4 + $0x1b4] sm:$0xf0]  ;;  %v1451_v45 = vld [vmem:[#allocation4 + $0x1a0] sm:$0xf] }
  0x9c   :  { %v1460_v38 = vor.u32 %v1762_v35, %v1459_v33  ;;  %v1452_v50 = vor.u32 %v1760_v47, %v1451_v45  ;;  %v1782_v33 = vld [vmem:[#allocation4 + $0x254] sm:$0xf0]  ;;  %v1781_v35 = vld [vmem:[#allocation4 + $0x254] sm:$0xf]  ;;  %v1780_v45 = vld [vmem:[#allocation4 + $0x244] sm:$0xf0]  ;;  %v1609_v47 = vor.u32 %v1797_v40, %v1606_v41 }
  0x9d   :  { %v91_v61 = vpop.f32.mrf.mxu0  ;;  %698 = vmatpush.bf16.msra.mxu0 %v1468_v26  ;;  %v1553_v26 = vor.u32 %v1783_v23, %v1550_v24  ;;  %v1516_v24 = vld [vmem:[#allocation4 + $0x220] sm:$0xf]  ;;  %v1510_v40 = vld [vmem:[#allocation4 + $0x218] sm:$0xf0] }
  0x9e   :  { %v1748_v61 = vld [vmem:[#allocation4 + $0x144] sm:$0xf0] }
  0x9f   :  { %709 = vmatpush.bf16.msra.mxu1 %v1424_v44  ;;  %722 = vmatpush.bf16.msra.mxu2 %v1488_v56  ;;  %v1404_v4 = vor.u32 %v1748_v61, %v1403_v60  ;;  %v1742_v44 = vld [vmem:[#allocation4 + $0x114] sm:$0xf0]  ;;  %v1740_v56 = vld [vmem:[#allocation4 + $0x104] sm:$0xf0]  ;;  %v1739_v60 = vld [vmem:[#allocation4 + $0x104] sm:$0xf] }
  0xa0   :  { %v1380_v46 = vor.u32 %v1742_v44, %v1379_v43  ;;  %v1372_v58 = vor.u32 %v1740_v56, %v1371_v55  ;;  %v1373_v61 = vld [vmem:[#allocation4 + $0x108] sm:$0xf0]  ;;  %v1532_v44 = vld [vmem:[#allocation4 + $0x240] sm:$0xf] }
  0xa1   :  { %685 = vmatpush.bf16.msrb.mxu3 %v1404_v4  ;;  %699 = vmatpush.bf16.msra.mxu0 %v1460_v38  ;;  %v1376_v63 = vor.u32 %v1739_v60, %v1373_v61  ;;  %v1756_v4 = vld [vmem:[#allocation4 + $0x184] sm:$0xf0]  ;;  %v1541_v38 = vor.u32 %v1782_v33, %v1540_v32  ;;  %v1533_v53 = vor.u32 %v1780_v45, %v1532_v44  ;;  %v1791_v32 = vld [vmem:[#allocation4 + $0x2a4] sm:$0xf]  ;;  %v1789_v44 = vld [vmem:[#allocation4 + $0x294] sm:$0xf] }
  0xa3   :  { %710 = vmatpush.bf16.msra.mxu1 %v1416_v59  ;;  %723 = vmatpush.bf16.msra.mxu2 %v1480_v3  ;;  %v1758_v59 = vld [vmem:[#allocation4 + $0x194] sm:$0xf0]  ;;  %v1435_v3 = vld [vmem:[#allocation4 + $0x180] sm:$0xf] }
  0xa4   :  { %v1444_v62 = vor.u32 %v1758_v59, %v1443_v57 }
  0xa5   :  { %686 = vmatpush.bf16.msrb.mxu3 %v1396_v22  ;;  %700 = vmatpush.bf16.msra.mxu0 %v1452_v50  ;;  %v1784_v22 = vld [vmem:[#allocation4 + $0x264] sm:$0xf0] }
  0xa6   :  { %v1549_v25 = vor.u32 %v1784_v22, %v1548_v20  ;;  %v1796_v50 = vld [vmem:[#allocation4 + $0x2c4] sm:$0xf0]  ;;  %v1793_v20 = vld [vmem:[#allocation4 + $0x2b4] sm:$0xf]  ;;  %v1590_v22 = vld [vmem:[#allocation4 + $0x2b8] sm:$0xf0] }
  0xa7   :  { %711 = vmatpush.bf16.msra.mxu1 %v1408_v6  ;;  %724 = vmatpush.bf16.msra.mxu2 %v1472_v30  ;;  %v1436_v6 = vor.u32 %v1756_v4, %v1435_v3  ;;  %v1597_v56 = vor.u32 %v1796_v50, %v1596_v49  ;;  %v1593_v23 = vor.u32 %v1793_v20, %v1590_v22  ;;  %v1772_v49 = vld [vmem:[#allocation4 + $0x204] sm:$0xf0]  ;;  %v1771_v50 = vld [vmem:[#allocation4 + $0x204] sm:$0xf] }
  0xa9   :  { %687 = vmatpush.bf16.msrb.mxu3 %v1388_v34  ;;  %701 = vmatpush.bf16.msra.mxu0 %v1444_v62  ;;  %v1617_v34 = vor.u32 %v1799_v29, %v1614_v31  ;;  %v1792_v31 = vld [vmem:[#allocation4 + $0x2a4] sm:$0xf0] }
  0xab   :  { %712 = vmatpush.bf16.msra.mxu1 %v1400_v27  ;;  %725 = vmatpush.bf16.msra.mxu2 %v1464_v42  ;;  %v1612_v27 = vld [vmem:[#allocation4 + $0x2e0] sm:$0xf]  ;;  %v1545_v42 = vor.u32 %v1781_v35, %v1542_v36  ;;  %v1508_v36 = vld [vmem:[#allocation4 + $0x210] sm:$0xf] }
  0xac   :  { %v1613_v30 = vor.u32 %v1800_v28, %v1612_v27  ;;  %v1518_v28 = vld [vmem:[#allocation4 + $0x228] sm:$0xf0] }
  0xad   :  { %688 = vmatpush.bf16.msrb.mxu3 %v1380_v46  ;;  %702 = vmatpush.bf16.msra.mxu0 %v1436_v6  ;;  %v1779_v46 = vld [vmem:[#allocation4 + $0x244] sm:$0xf] }
  0xae   :  { %v1537_v55 = vor.u32 %v1779_v46, %v1534_v48  ;;  %v1574_v46 = vld [vmem:[#allocation4 + $0x298] sm:$0xf0]  ;;  %v1500_v48 = vld [vmem:[#allocation4 + $0x200] sm:$0xf] }
  0xaf   :  { %713 = vmatpush.bf16.msra.mxu1 %v1392_v39  ;;  %726 = vmatpush.bf16.msra.mxu2 %v1456_v54  ;;  %v1798_v39 = vld [vmem:[#allocation4 + $0x2d4] sm:$0xf0] }
  0xb0   :  { %v1605_v43 = vor.u32 %v1798_v39, %v1604_v37  ;;  %v1774_v37 = vld [vmem:[#allocation4 + $0x214] sm:$0xf0] }
  0xb1   :  { %689 = vmatpush.bf16.msrb.mxu3 %v1372_v58  ;;  %v1239_v58 = vld [vmem:[%s2109_s6 + $0x2] ss:$8 sm:$0x3]  ;;  %v1509_v39 = vor.u32 %v1774_v37, %v1508_v36 }
  0xb2   :  { %v262_v59 = vperm.slane %v1239_v58, 0  ;;  %v263_v62 = vperm.slane %v1239_v58, 1  ;;  %v1566_v58 = vld [vmem:[#allocation4 + $0x288] sm:$0xf0] }
  0xb3   :  { %714 = vmatpush.bf16.msra.mxu1 %v1384_v51  ;;  %727 = vmatpush.bf16.msra.mxu2 %v1448_v2  ;;  %v1795_v51 = vld [vmem:[#allocation4 + $0x2c4] sm:$0xf] }
  0xb4   :  { %v1601_v57 = vor.u32 %v1795_v51, %v1598_v52  ;;  %v1501_v51 = vor.u32 %v1772_v49, %v1500_v48  ;;  %v1502_v52 = vld [vmem:[#allocation4 + $0x208] sm:$0xf0] }
  0xb7   :  { %715 = vmatpush.bf16.msra.mxu1 %v1376_v63 }
 0x117   :  { %v206_v8 = vpop.f32.mrf.mxu1 }
 0x118   :  { %v207_v9 = vadd.f32 %v206_v8, %v113_v7  ;;  %v1437_v7 = vld [vmem:[#allocation4 + $0x188] sm:$0xf0] }
 0x119   :  { %v1440_v8 = vor.u32 %v1755_v5, %v1437_v7 }
 0x11a   :  { %v223_v10 = vmax.f32 %v207_v9, 0.0  ;;  %v1556_v9 = vld [vmem:[#allocation4 + $0x270] sm:$0xf] }
 0x11b   :  { %728 = vmatpush.bf16.msra.mxu2 %v1440_v8 }
 0x11c   :  { %v225_v12 = vpack.c.bf16 %v223_v10, %v223_v10  ;;  %v1786_v10 = vld [vmem:[#allocation4 + $0x274] sm:$0xf0] }
 0x11d   :  { %v219_v13 = vpop.f32.mrf.mxu2 }
 0x11e   :  { %v220_v14 = vadd.f32 %v219_v13, %v114_v11  ;;  %434 = vmatmul.bf16.vlgmr.msra.gmra.mxu3 %v225_v12  ;;  %460 = vmatmul.bf16.vlgmr.msrb.gmra.mxu1 %v225_v12  ;;  %v1785_v11 = vld [vmem:[#allocation4 + $0x274] sm:$0xf]  ;;  %v1557_v12 = vor.u32 %v1786_v10, %v1556_v9  ;;  %v1558_v13 = vld [vmem:[#allocation4 + $0x278] sm:$0xf0] }
 0x11f   :  { %v208_v15 = vpop.f32.mrf.mxu1 }
 0x120   :  { %v224_v16 = vmax.f32 %v220_v14, 0.0  ;;  %v1620_v14 = vld [vmem:[#allocation4 + $0x2f0] sm:$0xf]  ;;  %v1802_v15 = vld [vmem:[#allocation4 + $0x2f4] sm:$0xf0]  ;;  %938 = vmatpush.bf16.msra.mxu3 %v1557_v12 }
 0x121   :  { %v1524_v12 = vld [vmem:[#allocation4 + $0x230] sm:$0xf] }
 0x122   :  { %v226_v17 = vpack.c.bf16 %v224_v16, %v224_v16  ;;  %v1561_v16 = vor.u32 %v1785_v11, %v1558_v13  ;;  %v1778_v13 = vld [vmem:[#allocation4 + $0x234] sm:$0xf0] }
 0x124   :  { %447 = vmatmul.bf16.vlgmr.msrb.gmra.mxu0 %v226_v17  ;;  %473 = vmatmul.bf16.vlgmr.msrb.gmra.mxu2 %v226_v17  ;;  %v1621_v17 = vor.u32 %v1802_v15, %v1620_v14  ;;  %v1777_v14 = vld [vmem:[#allocation4 + $0x234] sm:$0xf]  ;;  %v1525_v15 = vor.u32 %v1778_v13, %v1524_v12 }
 0x125   :  { %v221_v18 = vpop.f32.mrf.mxu2  ;;  %964 = vmatpush.bf16.msrb.mxu1 %v1561_v16  ;;  %939 = vmatpush.bf16.msra.mxu3 %v1549_v25  ;;  %v1526_v16 = vld [vmem:[#allocation4 + $0x238] sm:$0xf0]  ;;  %v1776_v25 = vld [vmem:[#allocation4 + $0x224] sm:$0xf0] }
 0x126   :  { %v1801_v18 = vld [vmem:[#allocation4 + $0x2f4] sm:$0xf]  ;;  %951 = vmatpush.bf16.msrb.mxu0 %v1621_v17  ;;  %v1529_v17 = vor.u32 %v1777_v14, %v1526_v16  ;;  %v1517_v27 = vor.u32 %v1776_v25, %v1516_v24  ;;  %v1805_v25 = vld [vmem:[%s2107_s4 + $0x10] sm:$0xff] }
 0x127   :  { %v1625_v21 = vor.u32 %v1801_v18, %v1622_v19  ;;  %v1588_v18 = vld [vmem:[#allocation4 + $0x2b0] sm:$0xf]  ;;  %v1794_v19 = vld [vmem:[#allocation4 + $0x2b4] sm:$0xf0] }
 0x128   :  { %v1814_v24 = vld [vmem:[%s2107_s4 + $0x58] sm:$0xff] }
 0x129   :  { %977 = vmatpush.bf16.msrb.mxu2 %v1625_v21  ;;  %965 = vmatpush.bf16.msrb.mxu1 %v1553_v26  ;;  %v1589_v21 = vor.u32 %v1794_v19, %v1588_v18  ;;  %v1775_v26 = vld [vmem:[#allocation4 + $0x224] sm:$0xf] }
 0x12a   :  { %952 = vmatpush.bf16.msrb.mxu0 %v1613_v30  ;;  %940 = vmatpush.bf16.msra.mxu3 %v1541_v38  ;;  %v1521_v29 = vor.u32 %v1775_v26, %v1518_v28  ;;  %v1580_v30 = vld [vmem:[#allocation4 + $0x2a0] sm:$0xf]  ;;  %v1773_v38 = vld [vmem:[#allocation4 + $0x214] sm:$0xf]  ;;  %v1813_v26 = vld [vmem:[%s2107_s4 + $0x50] sm:$0xff] }
 0x12b   :  { %v1581_v33 = vor.u32 %v1792_v31, %v1580_v30  ;;  %v1513_v41 = vor.u32 %v1773_v38, %v1510_v40  ;;  %v1812_v28 = vld [vmem:[%s2107_s4 + $0x48] sm:$0xff]  ;;  %v1811_v30 = vld [vmem:[%s2107_s4 + $0x40] sm:$0xff] }
 0x12c   :  { %v1497_v31 = vld [vmem:[%s2109_s6 + $0x4] ss:$8 sm:$0x3] }
 0x12d   :  { %978 = vmatpush.bf16.msrb.mxu2 %v1617_v34  ;;  %966 = vmatpush.bf16.msrb.mxu1 %v1545_v42  ;;  %v1582_v34 = vld [vmem:[#allocation4 + $0x2a8] sm:$0xf0]  ;;  %v1572_v42 = vld [vmem:[#allocation4 + $0x290] sm:$0xf] }
 0x12e   :  { %953 = vmatpush.bf16.msrb.mxu0 %v1605_v43  ;;  %941 = vmatpush.bf16.msra.mxu3 %v1533_v53  ;;  %v1585_v35 = vor.u32 %v1791_v32, %v1582_v34  ;;  %v1790_v43 = vld [vmem:[#allocation4 + $0x294] sm:$0xf0]  ;;  %v1505_v53 = vor.u32 %v1771_v50, %v1502_v52  ;;  %v775_v34 = vperm.slane %v1497_v31, 1 }
 0x12f   :  { %v1573_v45 = vor.u32 %v1790_v43, %v1572_v42 }
 0x131   :  { %979 = vmatpush.bf16.msrb.mxu2 %v1609_v47  ;;  %967 = vmatpush.bf16.msrb.mxu1 %v1537_v55  ;;  %v1577_v47 = vor.u32 %v1789_v44, %v1574_v46  ;;  %v1788_v55 = vld [vmem:[#allocation4 + $0x284] sm:$0xf0] }
 0x132   :  { %954 = vmatpush.bf16.msrb.mxu0 %v1597_v56  ;;  %942 = vmatpush.bf16.msra.mxu3 %v1525_v15  ;;  %v1787_v56 = vld [vmem:[#allocation4 + $0x284] sm:$0xf] }
 0x135   :  { %980 = vmatpush.bf16.msrb.mxu2 %v1601_v57  ;;  %968 = vmatpush.bf16.msrb.mxu1 %v1529_v17 }
 0x136   :  { %955 = vmatpush.bf16.msrb.mxu0 %v1589_v21  ;;  %943 = vmatpush.bf16.msra.mxu3 %v1517_v27  ;;  %v1804_v27 = vld [vmem:[%s2107_s4 + $0x8] sm:$0xff] }
 0x139   :  { %981 = vmatpush.bf16.msrb.mxu2 %v1593_v23  ;;  %969 = vmatpush.bf16.msrb.mxu1 %v1521_v29  ;;  %v1806_v23 = vld [vmem:[%s2107_s4 + $0x18] sm:$0xff]  ;;  %v1803_v29 = vld [vmem:[%s2107_s4] sm:$0xff] }
 0x13a   :  { %956 = vmatpush.bf16.msrb.mxu0 %v1581_v33  ;;  %944 = vmatpush.bf16.msra.mxu3 %v1509_v39 }
 0x13d   :  { %982 = vmatpush.bf16.msrb.mxu2 %v1585_v35  ;;  %970 = vmatpush.bf16.msrb.mxu1 %v1513_v41  ;;  %v774_v35 = vperm.slane %v1497_v31, 0 }
 0x13e   :  { %957 = vmatpush.bf16.msrb.mxu0 %v1573_v45  ;;  %945 = vmatpush.bf16.msra.mxu3 %v1501_v51  ;;  %v1026_v51 = vld [vmem:[%s2109_s6 + $0x5] ss:$0 sm:$0xff] }
 0x141   :  { %983 = vmatpush.bf16.msrb.mxu2 %v1577_v47  ;;  %971 = vmatpush.bf16.msrb.mxu1 %v1505_v53 }
 0x19b   :  { %v461_v54 = vpop.f32.mrf.mxu1 }
 0x19c   :  { %v462_v2 = vadd.f32 %v461_v54, %v263_v62  ;;  %v1564_v54 = vld [vmem:[#allocation4 + $0x280] sm:$0xf]  ;;  %v1809_v62 = vld [vmem:[%s2107_s4 + $0x30] sm:$0xff] }
 0x19d   :  { %v1565_v57 = vor.u32 %v1788_v55, %v1564_v54 }
 0x19f   :  { %958 = vmatpush.bf16.msrb.mxu0 %v1565_v57 }
 0x1a1   :  { %v435_v60 = vpop.f32.mrf.mxu3  ;;  %v448_v61 = vpop.f32.mrf.mxu0 }
 0x1a2   :  { %v436_v63 = vadd.f32 %v435_v60, %v262_v59  ;;  %v1569_v59 = vor.u32 %v1787_v56, %v1566_v58  ;;  %v1810_v60 = vld [vmem:[%s2107_s4 + $0x38] sm:$0xff]  ;;  %v1823_v56 = vld [vmem:[%s2108_s5] ss:$0 sm:$0xff] }
 0x1a3   :  { %v463_v0 = vpop.f32.mrf.mxu1 }
 0x1a4   :  { %v449_v1 = vadd.f32 %v448_v61, %v436_v63  ;;  %984 = vmatpush.bf16.msrb.mxu2 %v1569_v59  ;;  %v1818_v61 = vld [vmem:[%s2107_s4 + $0x78] sm:$0xff]  ;;  %v1817_v63 = vld [vmem:[%s2107_s4 + $0x70] sm:$0xff]  ;;  %v1808_v0 = vld [vmem:[%s2107_s4 + $0x28] sm:$0xff] }
 0x1a6   :  { %v478_v3 = vmax.f32 %v449_v1, 0.0  ;;  %v1816_v1 = vld [vmem:[%s2107_s4 + $0x68] sm:$0xff] }
 0x1a7   :  { %v474_v4 = vpop.f32.mrf.mxu2 }
 0x1a8   :  { %v480_v5 = vpack.c.bf16 %v478_v3, %v478_v3  ;;  %v475_v6 = vadd.f32 %v474_v4, %v462_v2  ;;  %v1807_v2 = vld [vmem:[%s2107_s4 + $0x20] sm:$0xff] }
 0x1a9   :  { %v437_v7 = vpop.f32.mrf.mxu3  ;;  %v450_v8 = vpop.f32.mrf.mxu0  ;;  %v1815_v3 = vld [vmem:[%s2107_s4 + $0x60] sm:$0xff] }
 0x1aa   :  { %v479_v9 = vmax.f32 %v475_v6, 0.0  ;;  %690 = vmatmul.bf16.vlgmr.msrb.gmra.mxu3 %v480_v5  ;;  %716 = vmatmul.bf16.vlgmr.msra.gmra.mxu1 %v480_v5  ;;  %v1368_v5 = vld [vmem:[%s2109_s6 + $0x3] ss:$8 sm:$0x3] }
 0x1ab   :  { %1123 = vmatpush.bf16.msrb.mxu3 %v1810_v60  ;;  %v518_v6 = vperm.slane %v1368_v5, 0  ;;  %v519_v8 = vperm.slane %v1368_v5, 1 }
 0x1ac   :  { %v481_v10 = vpack.c.bf16 %v479_v9, %v479_v9 }
 0x1ae   :  { %703 = vmatmul.bf16.vlgmr.msra.gmra.mxu0 %v481_v10  ;;  %729 = vmatmul.bf16.vlgmr.msra.gmra.mxu2 %v481_v10 }
 0x1af   :  { %v476_v11 = vpop.f32.mrf.mxu2  ;;  %1136 = vmatpush.bf16.msra.mxu0 %v1818_v61  ;;  %1124 = vmatpush.bf16.msrb.mxu3 %v1809_v62  ;;  %v1159_v61 = vld [vmem:[%s2109_s6 + $0x6] ss:$0 sm:$0xff] }
 0x1b3   :  { %1137 = vmatpush.bf16.msra.mxu0 %v1817_v63  ;;  %1125 = vmatpush.bf16.msrb.mxu3 %v1808_v0 }
 0x1b7   :  { %1138 = vmatpush.bf16.msra.mxu0 %v1816_v1  ;;  %1126 = vmatpush.bf16.msrb.mxu3 %v1807_v2 }
 0x1bb   :  { %1139 = vmatpush.bf16.msra.mxu0 %v1815_v3  ;;  %1127 = vmatpush.bf16.msrb.mxu3 %v1806_v23 }
 0x1bf   :  { %1140 = vmatpush.bf16.msra.mxu0 %v1814_v24  ;;  %1128 = vmatpush.bf16.msrb.mxu3 %v1805_v25 }
 0x1c3   :  { %1141 = vmatpush.bf16.msra.mxu0 %v1813_v26  ;;  %1129 = vmatpush.bf16.msrb.mxu3 %v1804_v27 }
 0x1c7   :  { %1142 = vmatpush.bf16.msra.mxu0 %v1812_v28  ;;  %1130 = vmatpush.bf16.msrb.mxu3 %v1803_v29 }
 0x1cb   :  { %1143 = vmatpush.bf16.msra.mxu0 %v1811_v30 }
 0x227   :  { %v717_v4 = vpop.f32.mrf.mxu1 }
 0x228   :  { %v718_v12 = vadd.f32 %v717_v4, %v519_v8 }
 0x22b   :  { %v704_v7 = vpop.f32.mrf.mxu0 }
 0x22d   :  { %v691_v9 = vpop.f32.mrf.mxu3 }
 0x22e   :  { %v692_v10 = vadd.f32 %v691_v9, %v518_v6 }
 0x22f   :  { %v719_v11 = vpop.f32.mrf.mxu1 }
 0x230   :  { %v705_v13 = vadd.f32 %v704_v7, %v692_v10 }
 0x231   :  { %v730_v14 = vpop.f32.mrf.mxu2 }
 0x232   :  { %v734_v15 = vmax.f32 %v705_v13, 0.0  ;;  %v731_v16 = vadd.f32 %v730_v14, %v718_v12 }
 0x233   :  { %v706_v17 = vpop.f32.mrf.mxu0 }
 0x234   :  { %v736_v18 = vpack.c.bf16 %v734_v15, %v734_v15  ;;  %v735_v19 = vmax.f32 %v731_v16, 0.0 }
 0x235   :  { %v693_v20 = vpop.f32.mrf.mxu3 }
 0x236   :  { %v737_v21 = vpack.c.bf16 %v735_v19, %v735_v19  ;;  %946 = vmatmul.bf16.vlgmr.msra.gmra.mxu3 %v736_v18  ;;  %972 = vmatmul.bf16.vlgmr.msrb.gmra.mxu1 %v736_v18 }
 0x238   :  { %959 = vmatmul.bf16.vlgmr.msrb.gmra.mxu0 %v737_v21  ;;  %985 = vmatmul.bf16.vlgmr.msrb.gmra.mxu2 %v737_v21 }
 0x239   :  { %v732_v22 = vpop.f32.mrf.mxu2 }
 0x2b3   :  { %v973_v32 = vpop.f32.mrf.mxu1 }
 0x2b4   :  { %v974_v37 = vadd.f32 %v973_v32, %v775_v34 }
 0x2b5   :  { %v960_v33 = vpop.f32.mrf.mxu0 }
 0x2b9   :  { %v947_v36 = vpop.f32.mrf.mxu3 }
 0x2ba   :  { %v948_v38 = vadd.f32 %v947_v36, %v774_v35 }
 0x2bb   :  { %v975_v39 = vpop.f32.mrf.mxu1  ;;  %v986_v40 = vpop.f32.mrf.mxu2 }
 0x2bc   :  { %v961_v41 = vadd.f32 %v960_v33, %v948_v38  ;;  %v987_v42 = vadd.f32 %v986_v40, %v974_v37 }
 0x2bd   :  { %v962_v43 = vpop.f32.mrf.mxu0 }
 0x2be   :  { %v990_v44 = vmax.f32 %v961_v41, 0.0  ;;  %v991_v45 = vmax.f32 %v987_v42, 0.0 }
 0x2c0   :  { %v992_v46 = vpack.c.bf16 %v990_v44, %v990_v44  ;;  %v993_v47 = vpack.c.bf16 %v991_v45, %v991_v45 }
 0x2c1   :  { %v949_v48 = vpop.f32.mrf.mxu3 }
 0x2c2   :  { %1131 = vmatmul.bf16.vlgmr.msrb.gmra.mxu3 %v992_v46  ;;  %1144 = vmatmul.bf16.vlgmr.msra.gmra.mxu0 %v993_v47 }
 0x2c3   :  { %v988_v49 = vpop.f32.mrf.mxu2 }
 0x33f   :  { %v1145_v50 = vpop.f32.mrf.mxu0 }
 0x345   :  { %v1132_v52 = vpop.f32.mrf.mxu3 }
 0x346   :  { %v1133_v53 = vadd.f32 %v1132_v52, %v1026_v51 }
 0x347   :  { %v1147_v54 = vpop.f32.mrf.mxu0 }
 0x348   :  { %v1146_v55 = vadd.f32 %v1145_v50, %v1133_v53 }
 0x34a   :  { %v1149_v57 = vmax.f32 %v1146_v55, 0.0 }
 0x34c   :  { %v1154_v58 = vmul.f32 %v1823_v56, %v1149_v57 }
 0x34d   :  { %v1134_v59 = vpop.f32.mrf.mxu3 }
 0x34e   :  { %v1156_v60 = vsel %vm1155_vm2, %v1154_v58, 0.0 }
 0x34f   :  { %1157 = vadd.xlane.f32.xlu0 %v1156_v60 }
 0x3c2   :  { %v1158_v62 = vpop.xlane.xlu0 %1157 }
 0x3c3   :  { %v1160_v63 = vadd.f32 %v1159_v61, %v1158_v62 }
 0x3c5   :  { %1162 = vst.msk [vmem:[%s2110_s7] sm:$0xff] %vm1161_vm3, %v1160_v63 }
 0x3c6   :  { %1167 = vsyncpa [#allocation3], 1 }
 0x3c7   :  { %1168 = vsyncpa [#allocation5], 1 }

</bundles_post_ra>
